<compile_context>
chip_gen: v7x
topology: tpu7x:2x2x1
jax: 0.10.0
libtpu: 0.0.40
codegen_flags: <defaults>
</compile_context>

<pallas_src>
import jax
import jax.numpy as jnp
from jax.experimental import pallas as pl
from jax.experimental.pallas import tpu as pltpu


_THRESHOLD = 0.001


# ----------------------------------------------------------------------------
# Kernel 1: eval-path thresholding  (SparseLayer.thresholding)
#   mask = (|x| > 1e-3).float();   sparsity = sum(mask, dim=1)[0, 0]
# Inputs are the real/imag parts flattened to (Ns*B, N) -> lane-dense (N last)
# instead of the original (B, N, 2) which wasted 126/128 lanes and hit masked
# vst.msk stores.  The dtype cast and the row-sum (keepdims, after the layout
# transpose) are fused into the kernel.
# ----------------------------------------------------------------------------
def _threshold_kernel(xr_ref, xi_ref, mask_ref, sums_ref):
    xr = xr_ref[...]
    xi = xi_ref[...]
    mag = jnp.sqrt(xr * xr + xi * xi)                    # |complex x| (EUP sqrt)
    maskf = (mag > jnp.float32(_THRESHOLD)).astype(jnp.float32)
    mask_ref[...] = maskf.astype(mask_ref.dtype)         # cast fused in-kernel
    sums_ref[...] = jnp.sum(maskf, axis=1, keepdims=True)


def threshold_pallas(xr2, xi2, mask_dtype=jnp.float32):
    """xr2/xi2: (Ns*B, N) float32, row 0 == (batch 0, signal 0) so that
    sums[0, 0] matches torch.sum(mask, dim=1)[0, 0]."""
    R, N = xr2.shape
    mask, sums = pl.pallas_call(
        _threshold_kernel,
        out_shape=(
            jax.ShapeDtypeStruct((R, N), mask_dtype),
            jax.ShapeDtypeStruct((R, 1), jnp.float32),
        ),
        in_specs=[
            pl.BlockSpec((R, N), lambda: (0, 0)),
            pl.BlockSpec((R, N), lambda: (0, 0)),
        ],
        out_specs=(
            pl.BlockSpec((R, N), lambda: (0, 0)),
            pl.BlockSpec((R, 1), lambda: (0, 0)),
        ),
    )(xr2, xi2)
    return sums[0, 0], mask


# ----------------------------------------------------------------------------
# Kernel 2: fused SALayer compute.  For each signal channel s in {0, 1}:
#   * sparse-mask multiply   (only a tiny (Ns, N) row mask is read — the
#     (B, N, 2) mask / x_sparse tensors never materialize in HBM)
#   * Linear(2N -> OUT) on the interleaved real/imag vector, rewritten as
#       sig_r @ W_even + sig_i @ W_odd  (+ bias)                    -> MXU
#   * divide by sparsity, ReLU
#   * complex steering projection (AH @ sig^T)^T / sparsity, written directly
#     in the torch view_as_real(...).permute(0, 2, 1) layout (lane-dense A).
# The sparsity scalar stays on-device and arrives as a (1, 1) f32 in SMEM.
# ----------------------------------------------------------------------------
def _sa_compute_kernel(scale_ref, maskv_ref, xr_ref, xi_ref,
                       we_ref, wo_ref, b_ref, ahr_ref, ahi_ref,
                       enc_ref, fft_ref):
    scale = scale_ref[0, 0]                 # sparsity (or N) — SMEM scalar
    we = we_ref[...]                        # (N, OUT)  rows for real parts
    wo = wo_ref[...]                        # (N, OUT)  rows for imag parts
    ahr = ahr_ref[...]                      # (N, A)    real(AH^T)
    ahi = ahi_ref[...]                      # (N, A)    imag(AH^T)
    bias = b_ref[...]                       # (1, OUT)
    for s in range(2):                      # two signal channels, unrolled
        m = maskv_ref[s:s + 1, :]           # (1, N) row mask, broadcast over B
        sr = xr_ref[s] * m                  # (B, N)   masked real part
        si = xi_ref[s] * m                  # (B, N)   masked imag part
        # --- sigEncode: Linear + /sparsity + ReLU (fused) ---
        z = (jnp.dot(sr, we, preferred_element_type=jnp.float32)
             + jnp.dot(si, wo, preferred_element_type=jnp.float32)
             + bias)
        enc_ref[s, :, :] = jnp.maximum(z / scale, 0.0)
        # --- steering projection: y = sig @ AH^T  (complex, split into real ops) ---
        yr = (jnp.dot(sr, ahr, preferred_element_type=jnp.float32)
              - jnp.dot(si, ahi, preferred_element_type=jnp.float32))
        yi = (jnp.dot(sr, ahi, preferred_element_type=jnp.float32)
              + jnp.dot(si, ahr, preferred_element_type=jnp.float32))
        fft_ref[s, 0, :, :] = yr / scale
        fft_ref[s, 1, :, :] = yi / scale


def sa_compute_pallas(scale11, maskv, xr, xi, we, wo, bias2d, ahrT, ahiT):
    S, B, N = xr.shape
    OUT = we.shape[1]
    A = ahrT.shape[1]
    # TODO(synk): for production batch sizes, add a grid over B (block (S, tb, N),
    # dimension_semantics=("parallel",)) and size tb against v7x's 64 MiB VMEM;
    # at demo scale a single block is optimal (amortizes launch overhead).
    enc, fft = pl.pallas_call(
        _sa_compute_kernel,
        out_shape=(
            jax.ShapeDtypeStruct((S, B, OUT), jnp.float32),
            jax.ShapeDtypeStruct((S, 2, B, A), jnp.float32),
        ),
        in_specs=[
            pl.BlockSpec(memory_space=pltpu.MemorySpace.SMEM),   # (1,1) sparsity
            pl.BlockSpec((S, N), lambda: (0, 0)),                # row masks
            pl.BlockSpec((S, B, N), lambda: (0, 0, 0)),          # real(x), s-major
            pl.BlockSpec((S, B, N), lambda: (0, 0, 0)),          # imag(x), s-major
            pl.BlockSpec((N, OUT), lambda: (0, 0)),              # W_even
            pl.BlockSpec((N, OUT), lambda: (0, 0)),              # W_odd
            pl.BlockSpec((1, OUT), lambda: (0, 0)),              # bias
            pl.BlockSpec((N, A), lambda: (0, 0)),                # real(AH^T)
            pl.BlockSpec((N, A), lambda: (0, 0)),                # imag(AH^T)
        ],
        out_specs=(
            pl.BlockSpec((S, B, OUT), lambda: (0, 0, 0)),
            pl.BlockSpec((S, 2, B, A), lambda: (0, 0, 0, 0)),
        ),
    )(scale11, maskv, xr, xi, we, wo, bias2d, ahrT, ahiT)
    return enc, fft


# ----------------------------------------------------------------------------
# Module wrappers (plain-JAX glue: RNG, parameter prep, layout plumbing)
# ----------------------------------------------------------------------------
def steering_vector(number_element, angles_deg):
    # TODO(synk): steering_vector() is not defined in the spec; standard
    # half-wavelength ULA model exp(j*pi*n*sin(theta)) is used here.
    n = jnp.arange(number_element, dtype=jnp.float32)[:, None]
    th = jnp.deg2rad(jnp.asarray(angles_deg, jnp.float32))[None, :]
    return jnp.exp(1j * (jnp.pi * n * jnp.sin(th)))        # (N, A) complex64


class SparseLayer:
    """JAX/Pallas port of models/SSNDCNet.py::SparseLayer (used inside SALayer)."""

    def __init__(self, input_size=10, max_sparsity=0.5):
        self.input_size = input_size
        self.max_zeros = int(input_size * max_sparsity)

    def thresholding(self, xr_sbn, xi_sbn, mask_dtype=jnp.float32):
        # xr/xi in signal-major (Ns, B, N) layout; mask returned in (Ns*B, N).
        S, B, N = xr_sbn.shape
        return threshold_pallas(xr_sbn.reshape(S * B, N),
                                xi_sbn.reshape(S * B, N), mask_dtype)

    def training_masks(self, key):
        """Row masks (Ns, N) + sparsity, all on-device (no host sync)."""
        N = self.input_size
        k0, k1, k2 = jax.random.split(key, 3)
        num_zeros = jax.random.randint(k0, (), 0, self.max_zeros + 1)   # traced
        # index i is zeroed iff its position in randperm is < num_zeros
        rank1 = jnp.argsort(jax.random.permutation(k1, N))
        rank2 = jnp.argsort(jax.random.permutation(k2, N))
        maskv = jnp.stack([rank1 >= num_zeros, rank2 >= num_zeros],
                          axis=0).astype(jnp.float32)                   # (2, N)
        sparsity = (N - num_zeros).astype(jnp.float32)
        return maskv, sparsity


class SALayer:
    """JAX/Pallas port of models/SSNDCNet.py::SALayer (forward pass)."""

    def __init__(self, number_element=10, output_size=2048, max_sparsity=0.5,
                 angles=None, *, key):
        if angles is None:
            angles = jnp.arange(-60.0, 60.5, 0.5)
        self.sparselayer = SparseLayer(number_element, max_sparsity)
        self.number_element = number_element
        self.output_size = output_size
        A = steering_vector(number_element, angles)        # (N, A) complex
        self.AH = jnp.conj(A).T                            # (A, N) complex
        self.AHrT = jnp.real(self.AH).T.astype(jnp.float32)   # (N, A)
        self.AHiT = jnp.imag(self.AH).T.astype(jnp.float32)   # (N, A)
        # nn.Linear(2N, OUT) params (torch default uniform init)
        kw, kb = jax.random.split(key)
        bound = 1.0 / (2 * number_element) ** 0.5
        self.W = jax.random.uniform(kw, (output_size, 2 * number_element),
                                    jnp.float32, -bound, bound)
        self.b = jax.random.uniform(kb, (output_size,), jnp.float32, -bound, bound)
        # pre-split interleaved weights: even rows hit real parts, odd rows imag
        Wt = self.W.T                                      # (2N, OUT)
        self.We = Wt[0::2, :]                              # (N, OUT)
        self.Wo = Wt[1::2, :]                              # (N, OUT)
        self.b2d = self.b[None, :]                         # (1, OUT)

    def __call__(self, x, is_sparse, *, training=False, key=None):
        B, N, Ns = x.shape
        assert Ns == 2
        # lane-dense, signal-major real/imag views: (Ns, B, N)
        xr = jnp.transpose(jnp.real(x), (2, 0, 1))
        xi = jnp.transpose(jnp.imag(x), (2, 0, 1))
        if is_sparse:
            if training:
                maskv, sparsity = self.sparselayer.training_masks(key)
            else:
                # eval: x_sparse == x, sparsity from the thresholding kernel
                sparsity, _mask = self.sparselayer.thresholding(xr, xi)
                maskv = jnp.ones((Ns, N), jnp.float32)
            scale = sparsity
        else:
            maskv = jnp.ones((Ns, N), jnp.float32)
            scale = jnp.float32(N)
        scale11 = jnp.reshape(scale, (1, 1)).astype(jnp.float32)
        enc, fft = sa_compute_pallas(scale11, maskv, xr, xi,
                                     self.We, self.Wo, self.b2d,
                                     self.AHrT, self.AHiT)
        sig1_encode, sig2_encode = enc[0], enc[1]                 # (B, OUT)
        sig1_FFT = jnp.transpose(fft[0], (1, 0, 2))               # (B, 2, A)
        sig2_FFT = jnp.transpose(fft[1], (1, 0, 2))               # (B, 2, A)
        return sig1_encode, sig1_FFT, sig2_encode, sig2_FFT


# ----------------------------------------------------------------------------
# Demo + correctness checks vs a pure-JAX reference of the torch math
# ----------------------------------------------------------------------------
if __name__ == "__main__":
    root = jax.random.PRNGKey(0)
    k_param, k_xr, k_xi, k_train = jax.random.split(root, 4)

    B, N, Ns = 2, 16, 2          # batch, number_element (input_size), 2 signals
    OUT = 256                    # sigEncode output size (small for the demo)
    angles = jnp.arange(-60.0, 61.0, 1.0)      # 121 steering angles

    xr0 = jax.random.normal(k_xr, (B, N, Ns), jnp.float32)
    xi0 = jax.random.normal(k_xi, (B, N, Ns), jnp.float32)
    xr0 = xr0.at[:, :4, :].multiply(1e-4)      # push some |x| below threshold
    xi0 = xi0.at[:, :4, :].multiply(1e-4)
    x = jax.lax.complex(xr0, xi0)              # (B, N, 2) complex64

    layer = SALayer(number_element=N, output_size=OUT, max_sparsity=0.5,
                    angles=angles, key=k_param)

    def reference(x_in, scale, maskv=None):
        xs = x_in if maskv is None else x_in * jnp.transpose(maskv)[None, :, :]
        def enc(sig):
            v = jnp.stack([jnp.real(sig), jnp.imag(sig)], -1).reshape(sig.shape[0], -1)
            z = jnp.matmul(v, layer.W.T, precision=jax.lax.Precision.HIGHEST) + layer.b
            return jnp.maximum(z / scale, 0.0)
        def fft(sig):
            y = jnp.matmul(layer.AH, sig.T, precision=jax.lax.Precision.HIGHEST).T / scale
            return jnp.transpose(jnp.stack([jnp.real(y), jnp.imag(y)], -1), (0, 2, 1))
        sig1, sig2 = xs[:, :, 0], xs[:, :, 1]
        return enc(sig1), fft(sig1), enc(sig2), fft(sig2)

    def check(outs, refs):
        for a, r in zip(outs, refs):
            assert a.shape == r.shape, (a.shape, r.shape)
            assert jnp.allclose(a, r, rtol=2e-2, atol=2e-2)

    # 1) eval path (is_sparse=True -> thresholding)
    out_eval = layer(x, is_sparse=True, training=False)
    jax.block_until_ready(out_eval)
    mask_full = (jnp.abs(x) > _THRESHOLD).astype(jnp.float32)      # (B, N, 2)
    scale_eval = jnp.sum(mask_full, axis=1)[0, 0]
    check(out_eval, reference(x, scale_eval))

    # thresholding kernel itself (mask produced in lane-dense (Ns*B, N) layout)
    xr_t = jnp.transpose(jnp.real(x), (2, 0, 1))
    xi_t = jnp.transpose(jnp.imag(x), (2, 0, 1))
    sp_k, mask_k = layer.sparselayer.thresholding(xr_t, xi_t)
    assert jnp.allclose(sp_k, scale_eval)
    assert jnp.array_equal(mask_k, jnp.transpose(mask_full, (2, 0, 1)).reshape(Ns * B, N))

    # 2) training path (random masking; num_zeros stays on-device, no host sync)
    out_tr = layer(x, is_sparse=True, training=True, key=k_train)
    jax.block_until_ready(out_tr)
    maskv_chk, sp_tr = layer.sparselayer.training_masks(k_train)
    check(out_tr, reference(x, sp_tr, maskv_chk))

    # 3) is_sparse = False path (divide by N)
    out_dense = layer(x, is_sparse=False)
    jax.block_until_ready(out_dense)
    check(out_dense, reference(x, jnp.float32(N)))

    print("KERNEL_OK")
</pallas_src>

<mosaic_0001>
module attributes {stable_mosaic.version = 11 : i64} {
  func.func @_threshold_kernel(%arg0: memref<4x16xf32, #tpu.memory_space<vmem>>, %arg1: memref<4x16xf32, #tpu.memory_space<vmem>>, %arg2: memref<4x16xf32, #tpu.memory_space<vmem>>, %arg3: memref<4x1xf32, #tpu.memory_space<vmem>>) attributes {dimension_semantics = [], scalar_prefetch = 0 : i64, scratch_operands = 0 : i64, tpu.core_type = #tpu.core_type<tc>} {
    %c0 = arith.constant 0 : index
    %c0_0 = arith.constant 0 : index
    %0 = vector.load %arg0[%c0, %c0_0] : memref<4x16xf32, #tpu.memory_space<vmem>>, vector<4x16xf32>
    %c0_1 = arith.constant 0 : index
    %c0_2 = arith.constant 0 : index
    %1 = vector.load %arg1[%c0_1, %c0_2] : memref<4x16xf32, #tpu.memory_space<vmem>>, vector<4x16xf32>
    %2 = arith.mulf %0, %0 : vector<4x16xf32>
    %3 = arith.mulf %1, %1 : vector<4x16xf32>
    %4 = arith.addf %2, %3 : vector<4x16xf32>
    %5 = math.sqrt %4 : vector<4x16xf32>
    %cst = arith.constant 1.000000e-03 : f32
    %6 = vector.broadcast %cst : f32 to vector<4x16xf32>
    %7 = arith.cmpf ogt, %5, %6 : vector<4x16xf32>
    %8 = arith.extui %7 : vector<4x16xi1> to vector<4x16xi32>
    %9 = arith.sitofp %8 : vector<4x16xi32> to vector<4x16xf32>
    %c0_3 = arith.constant 0 : index
    %c0_4 = arith.constant 0 : index
    %10 = vector.load %arg2[%c0_3, %c0_4] : memref<4x16xf32, #tpu.memory_space<vmem>>, vector<4x16xf32>
    tpu.vector_store %arg2[%c0_3, %c0_4], %9 {strides = array<i32>} : memref<4x16xf32, #tpu.memory_space<vmem>>, vector<4x16xf32>,
    %cst_5 = arith.constant dense<0.000000e+00> : vector<4xf32>
    %11 = vector.multi_reduction <add>, %9, %cst_5 [1] : vector<4x16xf32> to vector<4xf32>
    %12 = vector.shape_cast %11 : vector<4xf32> to vector<4x1xf32>
    %c0_6 = arith.constant 0 : index
    %c0_7 = arith.constant 0 : index
    %13 = vector.load %arg3[%c0_6, %c0_7] : memref<4x1xf32, #tpu.memory_space<vmem>>, vector<4x1xf32>
    tpu.vector_store %arg3[%c0_6, %c0_7], %12 {strides = array<i32>} : memref<4x1xf32, #tpu.memory_space<vmem>>, vector<4x1xf32>,
    return
  }
}

</mosaic_0001>

<bundles_post_ra>
// kernel: tpu_custom_call.1
= control target key start
LH: loop header
LB: loop body
LE: loop exit
PB: predicated region body
PF: predicated region fallthrough
CT: control target
= control target key end

     0   :  { %9 = vsyncpa [#allocation3], 0  ;;  %s222_s0 = inlined_call_operand.hbm [shape: f32[4,16], index: 0, kind: input, shape index: {}]   ;;  %s223_s1 = inlined_call_operand.hbm [shape: f32[4,16], index: 1, kind: input, shape index: {}]   ;;  %s224_s2 = inlined_call_operand.hbm [shape: f32[4,16], index: 2, kind: output, shape index: {0}]   ;;  %s225_s3 = inlined_call_operand.vmem [shape: f32[4,1], index: 3, kind: output, shape index: {1}]  }
   0x1   :  { %10 = vsyncpa [#allocation6], 0 }
   0x2   :  { %11 = vsyncpa [#allocation4], 0  ;;  %s159_s12 = smov [#allocation2]   ;;  %s160_s14 = smov [#allocation5]  }
   0x3   :  { %s18_s13 = sshll.u32 %s159_s12, 4  ;;  %s28_s15 = sshll.u32 %s160_s14, 4  ;;  %s19_s13 = int_to_ptr.vmem [resolvable:$true] %s18_s13  ;;  %s29_s15 = int_to_ptr.vmem [resolvable:$true] %s28_s15 }
   0x4   :  { %s87_s18 = scalar_lea.hbm %s222_s0, 64 }
   0x5   :  { %p88_p0 = scmp.ne.s32.totalorder %s222_s0, %s87_s18  ;;  %p91_p1 = scmp.lt.u32.totalorder %s87_s18, %s222_s0 }
   0x7   :  { %p93_p2 = pnand %p91_p1, %p88_p0 }
   0x9   :  { %96 = shalt.err (!%p93_p2)
}
   0xa   :  { %s97_s23 = scalar_lea.vmem %s19_s13, 64  ;;  %p102_p4 = scmp.lt.s32.totalorder %s19_s13, %s19_s13 }
   0xb   :  { %p98_p3 = scmp.ne.s32.totalorder %s19_s13, %s97_s23  ;;  %p103_p5 = scmp.lt.s32.totalorder %s97_s23, %s97_s23 }
   0xd   :  { %p104_p6 = por %p103_p5, %p102_p4 }
   0xf   :  { %p105_p7 = pnand %p104_p6, %p98_p3 }
  0x11   :  { %108 = shalt.err (!%p105_p7)
}
  0x12   :  { %21 = dma.hbm_to_vmem [thread:$0]  %s222_s0, 64, %s19_s13, [#allocation3]  }
  0x13   :  { %s109_s28 = scalar_lea.hbm %s223_s1, 64 }
  0x14   :  { %p110_p8 = scmp.ne.s32.totalorder %s223_s1, %s109_s28  ;;  %p113_p9 = scmp.lt.u32.totalorder %s109_s28, %s223_s1 }
  0x16   :  { %p115_p10 = pnand %p113_p9, %p110_p8 }
  0x18   :  { %118 = shalt.err (!%p115_p10)
}
  0x19   :  { %s119_s6 = scalar_lea.vmem %s29_s15, 64  ;;  %p124_p12 = scmp.lt.s32.totalorder %s29_s15, %s29_s15 }
  0x1a   :  { %p120_p11 = scmp.ne.s32.totalorder %s29_s15, %s119_s6  ;;  %p125_p13 = scmp.lt.s32.totalorder %s119_s6, %s119_s6 }
  0x1c   :  { %p126_p0 = por %p125_p13, %p124_p12 }
  0x1e   :  { %p127_p1 = pnand %p126_p0, %p120_p11 }
  0x20   :  { %130 = shalt.err (!%p127_p1)
}
  0x21   :  { %31 = dma.hbm_to_vmem [thread:$0]  %s223_s1, 64, %s29_s15, [#allocation6]  }
  0x22   :  { %153 = dma.done.wait [#allocation3], 64  }
  0x23   :  { %154 = vsyncadd [#allocation3], 4294967232 }
  0x24   :  { %155 = dma.done.wait [#allocation6], 64  }
  0x25   :  { %156 = vsyncadd [#allocation6], 4294967232  ;;  %v38_v0 = vld [vmem:[#allocation2] sm:$0xf]  ;;  %v39_v1 = vld [vmem:[#allocation5] sm:$0xf] }
  0x26   :  { %v40_v2 = vmul.f32 %v38_v0, %v38_v0  ;;  %v41_v3 = vmul.f32 %v39_v1, %v39_v1  ;;  %vm53_vm2 = vcmask 125952   ;;  %v161_v10 = vmov 0.0   ;;  %s162_s1 = smov [#allocation7]  }
  0x27   :  { %s66_s8 = sshll.u32 %s162_s1, 4  ;;  %s67_s8 = int_to_ptr.vmem [resolvable:$true] %s66_s8 }
  0x28   :  { %v42_v4 = vadd.f32 %v41_v3, %v40_v2  ;;  %s131_s9 = scalar_lea.vmem %s67_s8, 64  ;;  %p136_p3 = scmp.lt.s32.totalorder %s67_s8, %s67_s8 }
  0x29   :  { %p132_p2 = scmp.ne.s32.totalorder %s67_s8, %s131_s9  ;;  %p137_p4 = scmp.lt.s32.totalorder %s131_s9, %s131_s9 }
  0x2a   :  { %85 = vrsqrt.f32 %v42_v4  ;;  %vm45_vm0 = vcmp.eq.f32.partialorder %v42_v4, inf  ;;  %v48_v6 = vand.u32 2147483648, %v42_v4  ;;  %vm47_vm1 = vcmp.eq.f32.partialorder %v42_v4, 0.0 }
  0x2b   :  { %p138_p5 = por %p137_p4, %p136_p3 }
  0x2d   :  { %p139_p6 = pnand %p138_p5, %p132_p2 }
  0x34   :  { %v86_v5 = vpop.eup %85 }
  0x35   :  { %v44_v7 = vmul.f32 %v86_v5, %v42_v4 }
  0x37   :  { %v46_v8 = vsel %vm45_vm0, %v42_v4, %v44_v7 }
  0x38   :  { %v49_v9 = vsel %vm47_vm1, %v48_v6, %v46_v8 }
  0x39   :  { %vm50_vm3 = vcmp.gt.f32.partialorder %v49_v9, 0.001 }
  0x3a   :  { %v80_v11 = vsel %vm50_vm3, 1.0, %v161_v10 }
  0x3b   :  { %v55_v12 = vsel %vm53_vm2, %v80_v11, 0.0  ;;  %54 = vst.msk [vmem:[#allocation7] sm:$0xf] %vm53_vm2, %v80_v11 }
  0x3c   :  { %56 = vadd.xlane.f32.xlu0 %v55_v12 }
  0x3d   :  { %142 = shalt.err (!%p139_p6)
}
  0x3e   :  { %s143_s12 = scalar_lea.hbm %s224_s2, 64 }
  0x3f   :  { %p144_p7 = scmp.ne.s32.totalorder %s224_s2, %s143_s12  ;;  %p147_p8 = scmp.lt.u32.totalorder %s143_s12, %s224_s2 }
  0x41   :  { %p149_p9 = pnand %p147_p8, %p144_p7 }
  0x43   :  { %152 = shalt.err (!%p149_p9)
}
  0x44   :  { %69 = dma.vmem_to_hbm [thread:$0]  %s67_s8, 64, %s224_s2, [#allocation4]   ;;  %vm58_vm4 = vcmask 3072  }
  0xc9   :  { %v57_v13 = vpop.xlane.xlu0 %56 }
  0xca   :  { %59 = vst.msk [vmem:[%s225_s3] sm:$0xf] %vm58_vm4, %v57_v13 }
  0xcb   :  { %157 = dma.done.wait [#allocation4], 64  }
  0xcc   :  { %158 = vsyncadd [#allocation4], 4294967232 }
  0xcd   :  { %77 = vsyncpa [#allocation3], 1 }
  0xce   :  { %78 = vsyncpa [#allocation6], 1 }
  0xcf   :  { %79 = vsyncpa [#allocation4], 1 }

</bundles_post_ra>
